<compile_context>
chip_gen: v5e
topology: v5e:2x2
jax: 0.10.0
libtpu: 0.0.40
codegen_flags: <defaults>
</compile_context>

<pallas_src>
import jax
import jax.numpy as jnp
from jax.experimental import pallas as pl
from jax.experimental.pallas import tpu as pltpu

EPS = 1e-5  # BatchNorm3d default eps


# ----------------------------- Pallas kernel --------------------------------
def _fused_conv_bn_relu_kernel(w_ref, p_ref, g_ref, b_ref, o_ref):
    # w: (C, K) bf16    patches: (K, P) bf16    gamma/beta: (C, 1) f32
    # out: (C, P) f32  — lane-dense store (P is a multiple of 128).
    y = jnp.dot(w_ref[...], p_ref[...],
                preferred_element_type=jnp.float32)          # (C, P) f32, MXU

    n = y.shape[1]
    s1 = jnp.sum(y, axis=1, keepdims=True)                   # (C, 1)
    s2 = jnp.sum(y * y, axis=1, keepdims=True)               # (C, 1)
    mean = s1 * (1.0 / n)
    var = s2 * (1.0 / n) - mean * mean                       # biased var (torch BN fwd)
    inv_std = jax.lax.rsqrt(var + EPS)

    scale = g_ref[...] * inv_std                              # (C, 1)
    shift = b_ref[...] - scale * mean                         # (C, 1)
    o_ref[...] = jnp.maximum(y * scale + shift, 0.0)          # BN affine + ReLU


def fused_conv_bn_relu(w_ct, patches_t, gamma, beta):
    """w_ct: (C, K) bf16, patches_t: (K, P) bf16, gamma/beta: (C, 1) f32.
    Returns (C, P) f32 — post-BN(+ReLU) activations, channel-major."""
    C, K = w_ct.shape
    P = patches_t.shape[1]
    return pl.pallas_call(
        _fused_conv_bn_relu_kernel,
        out_shape=jax.ShapeDtypeStruct((C, P), jnp.float32),
        grid=(1,),
        in_specs=[
            pl.BlockSpec((C, K), lambda i: (0, 0)),
            pl.BlockSpec((K, P), lambda i: (0, 0)),
            pl.BlockSpec((C, 1), lambda i: (0, 0)),
            pl.BlockSpec((C, 1), lambda i: (0, 0)),
        ],
        out_specs=pl.BlockSpec((C, P), lambda i: (0, 0)),
        compiler_params=pltpu.CompilerParams(
            dimension_semantics=("arbitrary",)),
    )(w_ct, patches_t, gamma, beta)


# ------------------------------- glue (JAX) ----------------------------------
def _im2col_3d_t(x, k, pad):
    """x: (N, Cin, D, H, W), stride=1 'same' conv.
    Returns transposed im2col patches (k^3*Cin, N*D*H*W); rows ordered
    tap-major / cin-minor to match the fused weight layout."""
    N, Cin, D, H, W = x.shape
    xp = jnp.pad(x, ((0, 0), (0, 0), (pad, pad), (pad, pad), (pad, pad)))
    taps = []
    for kd in range(k):
        for kh in range(k):
            for kw in range(k):
                taps.append(xp[:, :, kd:kd + D, kh:kh + H, kw:kw + W])
    pat = jnp.stack(taps, axis=0)                     # (k^3, N, Cin, D, H, W)
    pat = jnp.transpose(pat, (0, 2, 1, 3, 4, 5))      # (k^3, Cin, N, D, H, W)
    return pat.reshape(k * k * k * Cin, N * D * H * W)


def mrfusion_forward(x, params, kernels, strides, paddings):
    """x: (N, Cin, D, H, W).  Returns (res, feat_list) like the torch module."""
    N, Cin, D, H, W = x.shape
    k_max = max(kernels)
    # The fused single-matmul formulation needs stride-1 'same' convolutions
    # (this is what the spec config uses); fail loudly otherwise.
    assert all(s == 1 for s in strides), "only stride=1 is supported"
    assert all(k % 2 == 1 and p == (k - 1) // 2
               for k, p in zip(kernels, paddings)), "only 'same' convs supported"
    pad = (k_max - 1) // 2

    # bf16 matmul operands (f32 accumulate in-kernel); halves im2col DMA bytes.
    patches_t = _im2col_3d_t(x.astype(jnp.bfloat16), k_max, pad)   # (K, P)

    # Build the fused weight: each branch embedded at the centre of the k_max
    # window.  Conv bias is intentionally dropped (cancelled by BN mean-sub).
    w_cols, gammas, betas, couts = [], [], [], []
    for (w, b, gamma, beta), k in zip(params, kernels):
        Cout = w.shape[0]
        off = (k_max - k) // 2
        w_t = jnp.transpose(w, (2, 3, 4, 1, 0))                    # (k,k,k,Cin,Cout)
        w_t = jnp.pad(w_t, ((off, k_max - k - off),) * 3 + ((0, 0), (0, 0)))
        w_cols.append(w_t.reshape(k_max ** 3 * Cin, Cout))
        gammas.append(gamma)
        betas.append(beta)
        couts.append(Cout)
    w_fused = jnp.concatenate(w_cols, axis=1)                      # (K, C_total)
    w_ct = jnp.transpose(w_fused).astype(jnp.bfloat16)             # (C_total, K)
    gamma_all = jnp.concatenate(gammas).reshape(-1, 1).astype(jnp.float32)
    beta_all = jnp.concatenate(betas).reshape(-1, 1).astype(jnp.float32)

    out_cp = fused_conv_bn_relu(w_ct, patches_t, gamma_all, beta_all)  # (C_total, P)

    # Single layout fix-up back to NCDHW; feats are channel slices (no concat).
    res = out_cp.reshape(-1, N, D, H, W).transpose(1, 0, 2, 3, 4)
    feat_list = []
    c0 = 0
    for Cout in couts:
        feat_list.append(res[:, c0:c0 + Cout])
        c0 += Cout
    return res, feat_list


# ------------------------- pure-JAX reference check --------------------------
def _ref_forward(x, params, kernels, strides, paddings):
    feats = []
    for (w, b, gamma, beta), k, s, p in zip(params, kernels, strides, paddings):
        # Same bf16 operand quantization as the kernel, f32 accumulation.
        y = jax.lax.conv_general_dilated(
            x.astype(jnp.bfloat16), w.astype(jnp.bfloat16), (s, s, s),
            [(p, p)] * 3, dimension_numbers=("NCDHW", "OIDHW", "NCDHW"),
            preferred_element_type=jnp.float32)
        y = y + b.reshape(1, -1, 1, 1, 1)          # bias kept here: BN cancels it
        mean = jnp.mean(y, axis=(0, 2, 3, 4), keepdims=True)
        var = jnp.mean((y - mean) ** 2, axis=(0, 2, 3, 4), keepdims=True)
        y = gamma.reshape(1, -1, 1, 1, 1) * (y - mean) / jnp.sqrt(var + EPS) \
            + beta.reshape(1, -1, 1, 1, 1)
        feats.append(jnp.maximum(y, 0.0))
    return jnp.concatenate(feats, axis=1), feats


# ---------------------------------- main --------------------------------------
if __name__ == "__main__":
    # MRFusion(in_features=4, out_features=8, kernel=[1,3], stride=[1,1], padding=[0,1])
    in_features, out_features = 4, 8
    kernels, strides, paddings = [1, 3], [1, 1], [0, 1]
    N, D, H, W = 2, 4, 8, 8   # P = N*D*H*W = 512 (lane-dense output)

    key = jax.random.PRNGKey(0)
    kx, kp = jax.random.split(key)
    x = jax.random.normal(kx, (N, in_features, D, H, W), jnp.float32)

    # Deterministic parameter init (synthetic weights, no checkpoint load).
    params = []
    for i, k in enumerate(kernels):
        kk = jax.random.fold_in(kp, i)
        kw_, kb_, kg_, kbt_ = jax.random.split(kk, 4)
        fan_in = in_features * k ** 3
        w = jax.random.normal(kw_, (out_features, in_features, k, k, k),
                              jnp.float32) / jnp.sqrt(float(fan_in))
        b = 0.1 * jax.random.normal(kb_, (out_features,), jnp.float32)
        gamma = 1.0 + 0.1 * jax.random.normal(kg_, (out_features,), jnp.float32)
        beta = 0.1 * jax.random.normal(kbt_, (out_features,), jnp.float32)
        params.append((w, b, gamma, beta))

    res, feat_list = mrfusion_forward(x, params, kernels, strides, paddings)
    res = jax.block_until_ready(res)
    feat_list = [jax.block_until_ready(f) for f in feat_list]

    # Sanity check against a plain-JAX reference (same train-mode BN semantics,
    # bias kept in the reference to confirm BN cancels it).
    res_ref, feats_ref = _ref_forward(x, params, kernels, strides, paddings)
    assert res.shape == (N, out_features * len(kernels), D, H, W), res.shape
    assert all(f.shape == (N, out_features, D, H, W) for f in feat_list)
    assert jnp.allclose(res, res_ref, atol=1e-3, rtol=1e-3), \
        float(jnp.max(jnp.abs(res - res_ref)))
    for f, fr in zip(feat_list, feats_ref):
        assert jnp.allclose(f, fr, atol=1e-3, rtol=1e-3)

    print("KERNEL_OK")
</pallas_src>

<mosaic_0001>
module attributes {stable_mosaic.version = 11 : i64} {
  func.func @_fused_conv_bn_relu_kernel(%arg0: i32, %arg1: memref<16x108xbf16, #tpu.memory_space<vmem>>, %arg2: memref<108x512xbf16, #tpu.memory_space<vmem>>, %arg3: memref<16x1xf32, #tpu.memory_space<vmem>>, %arg4: memref<16x1xf32, #tpu.memory_space<vmem>>, %arg5: memref<16x512xf32, #tpu.memory_space<vmem>>) attributes {dimension_semantics = [#tpu.dimension_semantics<arbitrary>], iteration_bounds = array<i64: 1>, scalar_prefetch = 0 : i64, scratch_operands = 0 : i64, tpu.core_type = #tpu.core_type<tc>, window_params = [{pipeline_mode = #tpu.pipeline_mode<synchronous>, transform_indices = @transform_0, window_bounds = array<i64: 16, 108>}, {pipeline_mode = #tpu.pipeline_mode<synchronous>, transform_indices = @transform_1, window_bounds = array<i64: 108, 512>}, {pipeline_mode = #tpu.pipeline_mode<synchronous>, transform_indices = @transform_2, window_bounds = array<i64: 16, 1>}, {pipeline_mode = #tpu.pipeline_mode<synchronous>, transform_indices = @transform_3, window_bounds = array<i64: 16, 1>}, {pipeline_mode = #tpu.pipeline_mode<synchronous>, transform_indices = @transform_4, window_bounds = array<i64: 16, 512>}]} {
    %c0 = arith.constant 0 : index
    %c0_0 = arith.constant 0 : index
    %0 = vector.load %arg1[%c0, %c0_0] : memref<16x108xbf16, #tpu.memory_space<vmem>>, vector<16x108xbf16>
    %c0_1 = arith.constant 0 : index
    %c0_2 = arith.constant 0 : index
    %1 = vector.load %arg2[%c0_1, %c0_2] : memref<108x512xbf16, #tpu.memory_space<vmem>>, vector<108x512xbf16>
    %cst = arith.constant dense<0.000000e+00> : vector<16x512xf32>
    %2 = tpu.matmul %0, %1, %cst {dimension_numbers = #tpu.dot_dimension_numbers<[1], [0], [0], [1], [0, 0, 1, 1], [], []>} : vector<16x108xbf16>, vector<108x512xbf16>, vector<16x512xf32> -> vector<16x512xf32>
    %cst_3 = arith.constant dense<0.000000e+00> : vector<16xf32>
    %3 = vector.multi_reduction <add>, %2, %cst_3 [1] : vector<16x512xf32> to vector<16xf32>
    %4 = vector.shape_cast %3 : vector<16xf32> to vector<16x1xf32>
    %5 = arith.mulf %2, %2 : vector<16x512xf32>
    %cst_4 = arith.constant dense<0.000000e+00> : vector<16xf32>
    %6 = vector.multi_reduction <add>, %5, %cst_4 [1] : vector<16x512xf32> to vector<16xf32>
    %7 = vector.shape_cast %6 : vector<16xf32> to vector<16x1xf32>
    %cst_5 = arith.constant 0.001953125 : f32
    %8 = vector.broadcast %cst_5 : f32 to vector<16x1xf32>
    %9 = arith.mulf %4, %8 : vector<16x1xf32>
    %cst_6 = arith.constant 0.001953125 : f32
    %10 = vector.broadcast %cst_6 : f32 to vector<16x1xf32>
    %11 = arith.mulf %7, %10 : vector<16x1xf32>
    %12 = arith.mulf %9, %9 : vector<16x1xf32>
    %13 = arith.subf %11, %12 : vector<16x1xf32>
    %cst_7 = arith.constant 9.99999974E-6 : f32
    %14 = vector.broadcast %cst_7 : f32 to vector<16x1xf32>
    %15 = arith.addf %13, %14 : vector<16x1xf32>
    %16 = math.rsqrt %15 : vector<16x1xf32>
    %c0_8 = arith.constant 0 : index
    %c0_9 = arith.constant 0 : index
    %17 = vector.load %arg3[%c0_8, %c0_9] : memref<16x1xf32, #tpu.memory_space<vmem>>, vector<16x1xf32>
    %18 = arith.mulf %17, %16 : vector<16x1xf32>
    %c0_10 = arith.constant 0 : index
    %c0_11 = arith.constant 0 : index
    %19 = vector.load %arg4[%c0_10, %c0_11] : memref<16x1xf32, #tpu.memory_space<vmem>>, vector<16x1xf32>
    %20 = arith.mulf %18, %9 : vector<16x1xf32>
    %21 = arith.subf %19, %20 : vector<16x1xf32>
    %22 = vector.broadcast %18 : vector<16x1xf32> to vector<16x512xf32>
    %23 = arith.mulf %2, %22 : vector<16x512xf32>
    %24 = vector.broadcast %21 : vector<16x1xf32> to vector<16x512xf32>
    %25 = arith.addf %23, %24 : vector<16x512xf32>
    %cst_12 = arith.constant 0.000000e+00 : f32
    %26 = vector.broadcast %cst_12 : f32 to vector<16x512xf32>
    %27 = arith.maximumf %25, %26 : vector<16x512xf32>
    %c0_13 = arith.constant 0 : index
    %c0_14 = arith.constant 0 : index
    %28 = vector.load %arg5[%c0_13, %c0_14] : memref<16x512xf32, #tpu.memory_space<vmem>>, vector<16x512xf32>
    tpu.vector_store %arg5[%c0_13, %c0_14], %27 {strides = array<i32>} : memref<16x512xf32, #tpu.memory_space<vmem>>, vector<16x512xf32>,
    return
  }
  func.func @transform_0(%arg0: i32) -> (i32, i32) {
    %c0_i32 = arith.constant 0 : i32
    %c0_i32_0 = arith.constant 0 : i32
    %c0_i32_1 = arith.constant 0 : i32
    return %c0_i32, %c0_i32_0 : i32, i32
  }
  func.func @transform_1(%arg0: i32) -> (i32, i32) {
    %c0_i32 = arith.constant 0 : i32
    %c0_i32_0 = arith.constant 0 : i32
    %c0_i32_1 = arith.constant 0 : i32
    return %c0_i32, %c0_i32_0 : i32, i32
  }
  func.func @transform_2(%arg0: i32) -> (i32, i32) {
    %c0_i32 = arith.constant 0 : i32
    %c0_i32_0 = arith.constant 0 : i32
    %c0_i32_1 = arith.constant 0 : i32
    return %c0_i32, %c0_i32_0 : i32, i32
  }
  func.func @transform_3(%arg0: i32) -> (i32, i32) {
    %c0_i32 = arith.constant 0 : i32
    %c0_i32_0 = arith.constant 0 : i32
    %c0_i32_1 = arith.constant 0 : i32
    return %c0_i32, %c0_i32_0 : i32, i32
  }
  func.func @transform_4(%arg0: i32) -> (i32, i32) {
    %c0_i32 = arith.constant 0 : i32
    %c0_i32_0 = arith.constant 0 : i32
    %c0_i32_1 = arith.constant 0 : i32
    return %c0_i32, %c0_i32_0 : i32, i32
  }
}

</mosaic_0001>

<bundles_post_ra>
// kernel: tpu_custom_call.1
= control target key start
LH: loop header
LB: loop body
LE: loop exit
PB: predicated region body
PF: predicated region fallthrough
CT: control target
= control target key end

     0   :  { %9 = vsyncpa [#allocation3], 0  ;;  %s738_s0 = inlined_call_operand.vmem [shape: bf16[16,108], index: 0, kind: input, shape index: {}]   ;;  %s739_s1 = inlined_call_operand.hbm [shape: bf16[108,512], index: 1, kind: input, shape index: {}]   ;;  %s740_s2 = inlined_call_operand.vmem [shape: f32[16,1], index: 2, kind: input, shape index: {}]   ;;  %s741_s3 = inlined_call_operand.vmem [shape: f32[16,1], index: 3, kind: input, shape index: {}]   ;;  %s742_s4 = inlined_call_operand.hbm [shape: f32[16,512], index: 4, kind: output, shape index: {}]  }
   0x1   :  { %10 = vsyncpa [#allocation4], 0  ;;  %s17_s17 = sshll.u32 %s739_s1, 4  ;;  %s633_s18 = smov [#allocation2]   ;;  %s18_s17 = int_to_ptr.hbm [resolvable:$true] %s17_s17 }
   0x2   :  { %s19_s19 = sshll.u32 %s633_s18, 4  ;;  %s634_s20 = smov 256   ;;  %s20_s19 = int_to_ptr.vmem [resolvable:$true] %s19_s19 }
   0x3   :  { %s635_s21 = smov 16  }
   0x4   :  { %25 = dma.hbm_to_vmem [thread:$0]  %s18_s17, 3584, %s20_s19, [#allocation3], %s634_s20, %s634_s20, %s635_s21  }
   0x5   :  { %629 = dma.done.wait [#allocation3], 3584  }
   0x6   :  { %630 = vsyncadd [#allocation3], 4294963712  ;;  %vm210_vm0 = vcmask 1045504   ;;  %v520_v0 = vld [vmem:[#allocation2 + $0xc0] sm:$0xf]  ;;  %vm206_vm1 = vcmask 883712  }
   0x7   :  { %v565_v1 = vld [vmem:[#allocation2 + $0xcc] sm:$0x30]  ;;  %v563_v2 = vld [vmem:[#allocation2 + $0xc4] sm:$0xf]  ;;  %v522_v4 = vld [vmem:[#allocation2 + $0xd0] sm:$0x30] }
   0x8   :  { %v521_v3 = vor.u32 %v565_v1, %v520_v0  ;;  %v528_v5 = vld [vmem:[#allocation2 + $0xc8] sm:$0xf]  ;;  %v566_v6 = vld [vmem:[#allocation2 + $0xd4] sm:$0x30]  ;;  %v525_v7 = vor.u32 %v563_v2, %v522_v4  ;;  %v564_v9 = vld [vmem:[#allocation2 + $0xcc] sm:$0xf] }
   0x9   :  { %v529_v8 = vor.u32 %v566_v6, %v528_v5  ;;  %v530_v10 = vld [vmem:[#allocation2 + $0xd8] sm:$0x30]  ;;  %v504_v11 = vld [vmem:[#allocation2 + $0xa0] sm:$0xf]  ;;  %v561_v14 = vld [vmem:[#allocation2 + $0xac] sm:$0xf0] }
   0xa   :  { %v212_v12 = vsel %vm210_vm0, %v521_v3, 0  ;;  %v533_v13 = vor.u32 %v564_v9, %v530_v10  ;;  %v559_v15 = vld [vmem:[#allocation2 + $0xa4] sm:$0xf]  ;;  %v215_v16 = vsel %vm210_vm0, %v525_v7, 0  ;;  %v505_v18 = vor.u32 %v561_v14, %v504_v11  ;;  %v506_v19 = vld [vmem:[#allocation2 + $0xb0] sm:$0xf0] }
   0xb   :  { %224 = vmatpush.bf16.msra.mxu0 %v212_v12  ;;  %v218_v17 = vsel %vm210_vm0, %v529_v8, 0  ;;  %v512_v20 = vld [vmem:[#allocation2 + $0xa8] sm:$0xf]  ;;  %238 = vmatpush.bf16.msra.mxu1 %v215_v16  ;;  %v509_v22 = vor.u32 %v559_v15, %v506_v19  ;;  %v562_v23 = vld [vmem:[#allocation2 + $0xb4] sm:$0xf0]  ;;  %s405_s6 = sshll.u32 %s742_s4, 4  ;;  %s406_s6 = int_to_ptr.hbm [resolvable:$true] %s405_s6 }
   0xc   :  { %252 = vmatpush.bf16.msra.mxu2 %v218_v17  ;;  %v221_v21 = vsel %vm210_vm0, %v533_v13, 0  ;;  %v560_v24 = vld [vmem:[#allocation2 + $0xac] sm:$0xf]  ;;  %v513_v25 = vor.u32 %v562_v23, %v512_v20  ;;  %v514_v26 = vld [vmem:[#allocation2 + $0xb8] sm:$0xf0]  ;;  %s638_s7 = smov 512  }
   0xd   :  { %266 = vmatpush.bf16.msra.mxu3 %v221_v21  ;;  %v488_v27 = vld [vmem:[#allocation2 + $0x80] sm:$0xf]  ;;  %v557_v28 = vld [vmem:[#allocation2 + $0x8c] sm:$0xf0]  ;;  %v517_v29 = vor.u32 %v560_v24, %v514_v26  ;;  %v555_v30 = vld [vmem:[#allocation2 + $0x84] sm:$0xf] }
   0xe   :  { %v490_v31 = vld [vmem:[#allocation2 + $0x90] sm:$0xf0]  ;;  %v496_v32 = vld [vmem:[#allocation2 + $0x88] sm:$0xf]  ;;  %v489_v33 = vor.u32 %v557_v28, %v488_v27  ;;  %v558_v34 = vld [vmem:[#allocation2 + $0x94] sm:$0xf0] }
   0xf   :  { %225 = vmatpush.bf16.msra.mxu0 %v505_v18  ;;  %v556_v35 = vld [vmem:[#allocation2 + $0x8c] sm:$0xf]  ;;  %v498_v36 = vld [vmem:[#allocation2 + $0x98] sm:$0xf0]  ;;  %239 = vmatpush.bf16.msra.mxu1 %v509_v22  ;;  %v493_v37 = vor.u32 %v555_v30, %v490_v31  ;;  %v497_v38 = vor.u32 %v558_v34, %v496_v32  ;;  %v472_v39 = vld [vmem:[#allocation2 + $0x60] sm:$0xf] }
  0x10   :  { %253 = vmatpush.bf16.msra.mxu2 %v513_v25  ;;  %v553_v40 = vld [vmem:[#allocation2 + $0x6c] sm:$0xf0]  ;;  %v551_v41 = vld [vmem:[#allocation2 + $0x64] sm:$0xf]  ;;  %v501_v42 = vor.u32 %v556_v35, %v498_v36  ;;  %v474_v43 = vld [vmem:[#allocation2 + $0x70] sm:$0xf0] }
  0x11   :  { %267 = vmatpush.bf16.msra.mxu3 %v517_v29  ;;  %v480_v44 = vld [vmem:[#allocation2 + $0x68] sm:$0xf]  ;;  %v554_v45 = vld [vmem:[#allocation2 + $0x74] sm:$0xf0]  ;;  %v552_v46 = vld [vmem:[#allocation2 + $0x6c] sm:$0xf]  ;;  %v473_v48 = vor.u32 %v553_v40, %v472_v39  ;;  %v477_v49 = vor.u32 %v551_v41, %v474_v43 }
  0x12   :  { %v482_v47 = vld [vmem:[#allocation2 + $0x78] sm:$0xf0]  ;;  %v481_v50 = vor.u32 %v554_v45, %v480_v44  ;;  %v456_v51 = vld [vmem:[#allocation2 + $0x40] sm:$0xf]  ;;  %v549_v52 = vld [vmem:[#allocation2 + $0x4c] sm:$0xf0] }
  0x13   :  { %226 = vmatpush.bf16.msra.mxu0 %v489_v33  ;;  %240 = vmatpush.bf16.msra.mxu1 %v493_v37  ;;  %v547_v53 = vld [vmem:[#allocation2 + $0x44] sm:$0xf]  ;;  %v485_v54 = vor.u32 %v552_v46, %v482_v47  ;;  %v458_v55 = vld [vmem:[#allocation2 + $0x50] sm:$0xf0]  ;;  %v464_v56 = vld [vmem:[#allocation2 + $0x48] sm:$0xf]  ;;  %v457_v60 = vor.u32 %v549_v52, %v456_v51 }
  0x14   :  { %254 = vmatpush.bf16.msra.mxu2 %v497_v38  ;;  %v550_v57 = vld [vmem:[#allocation2 + $0x54] sm:$0xf0]  ;;  %v548_v58 = vld [vmem:[#allocation2 + $0x4c] sm:$0xf]  ;;  %v466_v59 = vld [vmem:[#allocation2 + $0x58] sm:$0xf0]  ;;  %v461_v61 = vor.u32 %v547_v53, %v458_v55 }
  0x15   :  { %268 = vmatpush.bf16.msra.mxu3 %v501_v42  ;;  %v465_v62 = vor.u32 %v550_v57, %v464_v56  ;;  %v440_v63 = vld [vmem:[#allocation2 + $0x20] sm:$0xf]  ;;  %v545_v0 = vld [vmem:[#allocation2 + $0x2c] sm:$0xf0]  ;;  %v543_v1 = vld [vmem:[#allocation2 + $0x24] sm:$0xf]  ;;  %v469_v2 = vor.u32 %v548_v58, %v466_v59 }
  0x16   :  { %v442_v3 = vld [vmem:[#allocation2 + $0x30] sm:$0xf0]  ;;  %v448_v4 = vld [vmem:[#allocation2 + $0x28] sm:$0xf]  ;;  %v546_v5 = vld [vmem:[#allocation2 + $0x34] sm:$0xf0]  ;;  %v441_v8 = vor.u32 %v545_v0, %v440_v63 }
  0x17   :  { %227 = vmatpush.bf16.msra.mxu0 %v473_v48  ;;  %241 = vmatpush.bf16.msra.mxu1 %v477_v49  ;;  %v544_v6 = vld [vmem:[#allocation2 + $0x2c] sm:$0xf]  ;;  %v450_v7 = vld [vmem:[#allocation2 + $0x38] sm:$0xf0]  ;;  %v445_v9 = vor.u32 %v543_v1, %v442_v3  ;;  %v449_v10 = vor.u32 %v546_v5, %v448_v4  ;;  %v424_v11 = vld [vmem:[#allocation2] sm:$0xf] }
  0x18   :  { %255 = vmatpush.bf16.msra.mxu2 %v481_v50  ;;  %v541_v12 = vld [vmem:[#allocation2 + $0xc] sm:$0xf0]  ;;  %v539_v13 = vld [vmem:[#allocation2 + $0x4] sm:$0xf]  ;;  %v453_v14 = vor.u32 %v544_v6, %v450_v7  ;;  %v426_v15 = vld [vmem:[#allocation2 + $0x10] sm:$0xf0] }
  0x19   :  { %269 = vmatpush.bf16.msra.mxu3 %v485_v54  ;;  %v432_v16 = vld [vmem:[#allocation2 + $0x8] sm:$0xf]  ;;  %v542_v17 = vld [vmem:[#allocation2 + $0x14] sm:$0xf0]  ;;  %v540_v18 = vld [vmem:[#allocation2 + $0xc] sm:$0xf]  ;;  %v425_v20 = vor.u32 %v541_v12, %v424_v11  ;;  %v429_v21 = vor.u32 %v539_v13, %v426_v15 }
  0x1a   :  { %v434_v19 = vld [vmem:[#allocation2 + $0x18] sm:$0xf0]  ;;  %v433_v22 = vor.u32 %v542_v17, %v432_v16  ;;  %v538_v24 = vld [vmem:[%s738_s0] sm:$0xff]  ;;  %v636_v53 = vmov 0   ;;  %s639_s8 = smov 32  }
  0x1b   :  { %228 = vmatpush.bf16.msra.mxu0 %v457_v60  ;;  %242 = vmatpush.bf16.msra.mxu1 %v461_v61  ;;  %v437_v23 = vor.u32 %v540_v18, %v434_v19  ;;  %v337_v12 = vld [vmem:[%s740_s2] sm:$0xff] }
  0x1c   :  { %256 = vmatpush.bf16.msra.mxu2 %v465_v62  ;;  %574 = vset.pattern.permute.xlu2 %v636_v53  ;;  %v341_v17 = vld [vmem:[%s741_s3] sm:$0xff] }
  0x1d   :  { %270 = vmatpush.bf16.msra.mxu3 %v469_v2  ;;  %575 = vset.pattern.permute.xlu0 %v636_v53 }
  0x1e   :  { %576 = vset.pattern.permute.xlu1 %v636_v53 }
  0x1f   :  { %229 = vmatpush.bf16.msra.mxu0 %v441_v8  ;;  %243 = vmatpush.bf16.msra.mxu1 %v445_v9 }
  0x20   :  { %257 = vmatpush.bf16.msra.mxu2 %v449_v10 }
  0x21   :  { %271 = vmatpush.bf16.msra.mxu3 %v453_v14 }
  0x23   :  { %230 = vmatpush.bf16.msra.mxu0 %v425_v20  ;;  %244 = vmatpush.bf16.msra.mxu1 %v429_v21 }
  0x24   :  { %258 = vmatpush.bf16.msra.mxu2 %v433_v22  ;;  %v338_v22 = vld [vmem:[%s740_s2 + $0x8] sm:$0xff]  ;;  %s637_s2 = smov [#allocation5]  }
  0x25   :  { %272 = vmatpush.bf16.msra.mxu3 %v437_v23 }
  0x26   :  { %534 = vmatmul.msk.bf16.vlgmr.msra.gmra.mxu0 %vm206_vm1, %v538_v24  ;;  %535 = vmatmul.msk.bf16.vlgmr.msra.gmra.mxu1 %vm206_vm1, %v538_v24 }
  0x27   :  { %536 = vmatmul.msk.bf16.vlgmr.msra.gmra.mxu2 %vm206_vm1, %v538_v24 }
  0x28   :  { %537 = vmatmul.msk.bf16.vlgmr.msra.gmra.mxu3 %vm206_vm1, %v538_v24 }
  0xa3   :  { %v675_v25 = vpop.f32.mrf.mxu0  ;;  %v677_v26 = vpop.f32.mrf.mxu1 }
  0xa4   :  { %v289_v27 = vmul.f32 %v675_v25, %v675_v25  ;;  %v290_v28 = vmul.f32 %v677_v26, %v677_v26  ;;  %v279_v29 = vadd.f32 %v677_v26, %v675_v25 }
  0xa6   :  { %v297_v30 = vadd.f32 %v290_v28, %v289_v27  ;;  %v342_v27 = vld [vmem:[%s741_s3 + $0x8] sm:$0xff]  ;;  %s403_s3 = sshll.u32 %s637_s2, 4  ;;  %s404_s3 = int_to_ptr.vmem [resolvable:$true] %s403_s3 }
  0xaa   :  { %v685_v31 = vpop.f32.mrf.mxu2 }
  0xab   :  { %v291_v32 = vmul.f32 %v685_v31, %v685_v31  ;;  %v689_v33 = vpop.f32.mrf.mxu3  ;;  %v280_v34 = vadd.f32 %v279_v29, %v685_v31  ;;  %v692_v35 = vpop.f32.mrf.mxu0 }
  0xac   :  { %v694_v36 = vpop.f32.mrf.mxu1  ;;  %v292_v37 = vmul.f32 %v689_v33, %v689_v33  ;;  %v293_v40 = vmul.f32 %v692_v35, %v692_v35 }
  0xad   :  { %v281_v38 = vadd.f32 %v280_v34, %v689_v33  ;;  %v298_v39 = vadd.f32 %v297_v30, %v291_v32  ;;  %v294_v41 = vmul.f32 %v694_v36, %v694_v36  ;;  %v284_v43 = vadd.f32 %v694_v36, %v692_v35 }
  0xaf   :  { %282 = vadd.xlane.f32.xlu0 %v281_v38  ;;  %v299_v42 = vadd.f32 %v298_v39, %v292_v37  ;;  %v302_v45 = vadd.f32 %v294_v41, %v293_v40 }
  0xb1   :  { %300 = vadd.xlane.f32.xlu1 %v299_v42 }
  0xb2   :  { %v705_v44 = vpop.f32.mrf.mxu2 }
  0xb3   :  { %v285_v46 = vadd.f32 %v284_v43, %v705_v44  ;;  %v295_v47 = vmul.f32 %v705_v44, %v705_v44  ;;  %v710_v48 = vpop.f32.mrf.mxu3 }
  0xb4   :  { %v296_v49 = vmul.f32 %v710_v48, %v710_v48 }
  0xb5   :  { %v286_v50 = vadd.f32 %v285_v46, %v710_v48  ;;  %v303_v51 = vadd.f32 %v302_v45, %v295_v47 }
  0xb7   :  { %287 = vadd.xlane.f32.xlu0 %v286_v50  ;;  %v304_v52 = vadd.f32 %v303_v51, %v296_v49 }
  0xb9   :  { %305 = vadd.xlane.f32.xlu1 %v304_v52 }
 0x122   :  { %v283_v54 = vpop.xlane.xlu0 %282 }
 0x123   :  { %v307_v55 = vmul.f32 0.001953125, %v283_v54 }
 0x124   :  { %v301_v56 = vpop.xlane.xlu1 %300 }
 0x125   :  { %v311_v57 = vmul.f32 %v307_v55, %v307_v55  ;;  %v309_v58 = vmul.f32 0.001953125, %v301_v56 }
 0x127   :  { %v313_v59 = vsub.f32 %v309_v58, %v311_v57 }
 0x129   :  { %v315_v60 = vadd.f32 1e-05, %v313_v59 }
 0x12a   :  { %v288_v61 = vpop.xlane.xlu0 %287 }
 0x12b   :  { %577 = vrsqrt.f32 %v315_v60  ;;  %v308_v62 = vmul.f32 0.001953125, %v288_v61  ;;  %vm323_vm3 = vweird.f32 %v315_v60 }
 0x12c   :  { %v306_v63 = vpop.xlane.xlu1 %305 }
 0x12d   :  { %v312_v0 = vmul.f32 %v308_v62, %v308_v62  ;;  %v310_v1 = vmul.f32 0.001953125, %v306_v63 }
 0x12f   :  { %v314_v2 = vsub.f32 %v310_v1, %v312_v0 }
 0x131   :  { %v578_v3 = vpop.eup %577  ;;  %v316_v4 = vadd.f32 1e-05, %v314_v2 }
 0x132   :  { %v318_v5 = vmul.f32 %v578_v3, %v315_v60  ;;  %vm324_vm2 = vweird.f32 %v578_v3 }
 0x133   :  { %579 = vrsqrt.f32 %v316_v4  ;;  %vm325_vm4 = vmor %vm323_vm3, %vm324_vm2  ;;  %vm333_vm6 = vweird.f32 %v316_v4 }
 0x134   :  { %v319_v6 = vmul.f32 %v578_v3, %v318_v5 }
 0x136   :  { %v320_v7 = vmul.f32 0.5, %v319_v6 }
 0x138   :  { %v321_v8 = vsub.f32 1.5, %v320_v7 }
 0x139   :  { %v580_v9 = vpop.eup %579 }
 0x13a   :  { %v328_v10 = vmul.f32 %v580_v9, %v316_v4  ;;  %v322_v11 = vmul.f32 %v578_v3, %v321_v8  ;;  %vm334_vm5 = vweird.f32 %v580_v9 }
 0x13b   :  { %vm335_vm7 = vmor %vm333_vm6, %vm334_vm5 }
 0x13c   :  { %v329_v13 = vmul.f32 %v580_v9, %v328_v10  ;;  %v326_v14 = vsel %vm325_vm4, %v578_v3, %v322_v11 }
 0x13d   :  { %v339_v15 = vmul.f32 %v337_v12, %v326_v14 }
 0x13e   :  { %v330_v16 = vmul.f32 0.5, %v329_v13 }
 0x13f   :  { %349 = vperm.xlu2 %574, %v339_v15   ;;  %v343_v18 = vmul.f32 %v339_v15, %v307_v55 }
 0x140   :  { %v331_v19 = vsub.f32 1.5, %v330_v16 }
 0x141   :  { %v345_v20 = vsub.f32 %v341_v17, %v343_v18 }
 0x142   :  { %v332_v21 = vmul.f32 %v580_v9, %v331_v19 }
 0x143   :  { %367 = vperm.xlu0 %575, %v345_v20  }
 0x144   :  { %v336_v23 = vsel %vm335_vm7, %v580_v9, %v332_v21 }
 0x145   :  { %v340_v24 = vmul.f32 %v338_v22, %v336_v23 }
 0x147   :  { %354 = vperm.xlu2 %574, %v340_v24   ;;  %v344_v28 = vmul.f32 %v340_v24, %v308_v62 }
 0x149   :  { %v346_v29 = vsub.f32 %v342_v27, %v344_v28 }
 0x14b   :  { %372 = vperm.xlu1 %576, %v346_v29  }
 0x199   :  { %v350_v30 = vpop.permute.xlu2 %349 }
 0x19a   :  { %v357_v32 = vmul.f32 %v350_v30, %v675_v25  ;;  %v358_v34 = vmul.f32 %v350_v30, %v677_v26  ;;  %v359_v37 = vmul.f32 %v350_v30, %v685_v31  ;;  %v360_v38 = vmul.f32 %v350_v30, %v689_v33 }
 0x1a1   :  { %v355_v49 = vpop.permute.xlu2 %354 }
 0x1a2   :  { %v361_v25 = vmul.f32 %v355_v49, %v692_v35  ;;  %v362_v26 = vmul.f32 %v355_v49, %v694_v36  ;;  %v363_v31 = vmul.f32 %v355_v49, %v705_v44  ;;  %v364_v33 = vmul.f32 %v355_v49, %v710_v48 }
 0x1b5   :  { %v368_v39 = vpop.permute.xlu0 %367 }
 0x1b6   :  { %v375_v40 = vadd.f32 %v368_v39, %v357_v32  ;;  %v376_v41 = vadd.f32 %v368_v39, %v358_v34  ;;  %v377_v42 = vadd.f32 %v368_v39, %v359_v37  ;;  %v378_v43 = vadd.f32 %v368_v39, %v360_v38 }
 0x1b8   :  { %v383_v45 = vmax.f32 %v375_v40, 0.0  ;;  %v384_v46 = vmax.f32 %v376_v41, 0.0  ;;  %v385_v47 = vmax.f32 %v377_v42, 0.0  ;;  %v386_v50 = vmax.f32 %v378_v43, 0.0 }
 0x1ba   :  { %391 = vst [vmem:[#allocation5] sm:$0xff] %v383_v45 }
 0x1bb   :  { %392 = vst [vmem:[#allocation5 + $0x8] sm:$0xff] %v384_v46 }
 0x1bc   :  { %393 = vst [vmem:[#allocation5 + $0x10] sm:$0xff] %v385_v47 }
 0x1bd   :  { %394 = vst [vmem:[#allocation5 + $0x18] sm:$0xff] %v386_v50  ;;  %v373_v51 = vpop.permute.xlu1 %372 }
 0x1be   :  { %v379_v52 = vadd.f32 %v373_v51, %v361_v25  ;;  %v380_v53 = vadd.f32 %v373_v51, %v362_v26  ;;  %v381_v54 = vadd.f32 %v373_v51, %v363_v31  ;;  %v382_v55 = vadd.f32 %v373_v51, %v364_v33 }
 0x1c0   :  { %v387_v35 = vmax.f32 %v379_v52, 0.0  ;;  %v388_v56 = vmax.f32 %v380_v53, 0.0  ;;  %v389_v36 = vmax.f32 %v381_v54, 0.0  ;;  %v390_v57 = vmax.f32 %v382_v55, 0.0 }
 0x1c2   :  { %395 = vst [vmem:[#allocation5 + $0x20] sm:$0xff] %v387_v35 }
 0x1c3   :  { %396 = vst [vmem:[#allocation5 + $0x28] sm:$0xff] %v388_v56 }
 0x1c4   :  { %397 = vst [vmem:[#allocation5 + $0x30] sm:$0xff] %v389_v36 }
 0x1c5   :  { %398 = vst [vmem:[#allocation5 + $0x38] sm:$0xff] %v390_v57 }
 0x1c6   :  { %411 = dma.vmem_to_hbm [thread:$0]  %s404_s3, 1024, %s406_s6, [#allocation4], %s638_s7, %s638_s7, %s639_s8  }
 0x1c7   :  { %631 = dma.done.wait [#allocation4], 1024  }
 0x1c8   :  { %632 = vsyncadd [#allocation4], 4294966272 }
 0x1c9   :  { %416 = vsyncpa [#allocation3], 1 }
 0x1ca   :  { %417 = vsyncpa [#allocation4], 1 }

</bundles_post_ra>
